<compile_context>
chip_gen: v7x
topology: tpu7x:2x2x1
jax: 0.10.0
libtpu: 0.0.40
codegen_flags: <defaults>
</compile_context>

<pallas_src>
import functools

import jax
import jax.numpy as jnp
from jax import lax
from jax.experimental import pallas as pl
from jax.experimental.pallas import tpu as pltpu

HIDDEN = 256
_ALIGN = 256    # batch tiles stay multiples of 256 (MXU-friendly, lane-dense out)
_MAX_TB = 2048  # VMEM-safe on every generation (f32 h1/h2 ~2 MB each at 2048)


def _device_info():
    """(num_tensorcores, bf16_epilogue) inferred from the attached TPU kind."""
    try:
        kind = jax.devices()[0].device_kind.lower()
    except Exception:
        kind = ""
    num_tc = 2 if "v7" in kind else 1            # v7x: 2 TCs/chip share the grid
    bf16_ep = ("v6" in kind) or ("v7" in kind)   # v5e has no bf16 VPU -> keep f32
    return num_tc, bf16_ep


_DEVICE_INFO = _device_info()


def _round_up(n, m):
    return ((n + m - 1) // m) * m


def _choose_tile(batch, num_tc):
    """Largest VMEM-safe tile; on multi-TC chips keep >= num_tc balanced tiles."""
    b_al = _round_up(max(batch, 1), _ALIGN)
    if num_tc > 1 and b_al >= num_tc * _ALIGN:
        per_core = _round_up(-(-b_al // num_tc), _ALIGN)
        return min(per_core, _MAX_TB)
    return min(b_al, _MAX_TB)


def _vmem_limit_bytes(tb, state_dim):
    """Deliberate scoped-VMEM budget: double-buffered blocks + f32 temporaries
    with headroom, clamped to a range that is safe from v5e up to v7x."""
    lane = lambda n: _round_up(n, 128)
    sub = lambda n: _round_up(n, 8)
    x_b = 2 * tb * lane(state_dim) * 2                        # bf16 x tile, 2 bufs
    o_b = 2 * sub(1) * tb * 4                                 # f32 (1, tb) out, 2 bufs
    w_b = 2 * (sub(state_dim) * HIDDEN + HIDDEN * HIDDEN      # w1, w2
               + 3 * sub(1) * HIDDEN) * 2                     # b1, b2, w3t
    w_b += 2 * sub(1) * lane(1) * 4                           # b3
    act_b = 4 * tb * HIDDEN * 4                               # h1/h2 + temporaries (f32)
    total = x_b + o_b + w_b + act_b + (4 << 20)
    return int(min(max(total, 16 << 20), 48 << 20))


def _value_net_kernel(x_ref, w1_ref, b1_ref, w2_ref, b2_ref, w3t_ref, b3_ref,
                      o_ref):
    # Epilogue (bias add + ReLU) dtype follows the bias dtype: bf16 on v6e/v7x,
    # f32 on v5e.  MXU inputs are bf16 with f32 accumulation in all cases.
    ep = b1_ref.dtype
    bf = jnp.bfloat16

    # fc1 + relu
    h1 = jnp.dot(x_ref[...], w1_ref[...], preferred_element_type=jnp.float32)
    h1 = jnp.maximum(h1.astype(ep) + b1_ref[...], 0).astype(bf)

    # fc2 + relu
    h2 = jnp.dot(h1, w2_ref[...], preferred_element_type=jnp.float32)
    h2 = jnp.maximum(h2.astype(ep) + b2_ref[...], 0).astype(bf)

    # fc3 computed transposed: (1,256) contracted with (tb,256) on the feature
    # axis -> (1, tb): lane-dense stored block (unmasked vst) instead of (tb,1).
    v = lax.dot_general(w3t_ref[...], h2,
                        dimension_numbers=(((1,), (1,)), ((), ())),
                        preferred_element_type=jnp.float32)
    o_ref[...] = (v + b3_ref[...]).astype(o_ref.dtype)


@functools.partial(jax.jit, static_argnames=("tb",))
def _forward_jit(x, p, *, tb):
    B, state_dim = x.shape
    nb = pl.cdiv(B, tb)
    b_pad = nb * tb
    if b_pad != B:  # ragged tail: pad batch so every tile is full (no OOB)
        x = jnp.pad(x, ((0, b_pad - B), (0, 0)))
    x_bf = x.astype(jnp.bfloat16)

    out = pl.pallas_call(
        _value_net_kernel,
        out_shape=jax.ShapeDtypeStruct((1, b_pad), jnp.float32),
        grid=(nb,),
        in_specs=[
            # x: streamed batch tile (double-buffered by Pallas)
            pl.BlockSpec((tb, state_dim), lambda i: (i, 0)),
            # weights / biases: constant index_map -> DMA'd once, VMEM-resident
            pl.BlockSpec((state_dim, HIDDEN), lambda i: (0, 0)),
            pl.BlockSpec((1, HIDDEN), lambda i: (0, 0)),
            pl.BlockSpec((HIDDEN, HIDDEN), lambda i: (0, 0)),
            pl.BlockSpec((1, HIDDEN), lambda i: (0, 0)),
            pl.BlockSpec((1, HIDDEN), lambda i: (0, 0)),
            pl.BlockSpec((1, 1), lambda i: (0, 0)),
        ],
        # lane-dense output block (1, tb)
        out_specs=pl.BlockSpec((1, tb), lambda i: (0, i)),
        compiler_params=pltpu.CompilerParams(
            dimension_semantics=("parallel",),
            vmem_limit_bytes=_vmem_limit_bytes(tb, state_dim)),
    )(x_bf, p["w1"], p["b1"], p["w2"], p["b2"], p["w3t"], p["b3"])

    # (1, B_pad) -> (B, 1) in the wrapper (cheap XLA slice/reshape).
    return out[0, :B][:, None]


def value_network_forward(x, prepared_params, tb=None):
    """x: (B, state_dim) f32.  prepared_params: from prepare_value_network_params.
    Returns (B, 1) f32.  `tb` override is for testing; must be a multiple of 256."""
    if tb is None:
        num_tc, _ = _DEVICE_INFO
        tb = _choose_tile(x.shape[0], num_tc)
    assert tb % _ALIGN == 0
    return _forward_jit(x, prepared_params, tb=tb)


def init_value_network_params(state_dim, key):
    """Deterministic f32 init mirroring nn.Linear default U(-1/sqrt(fan_in), +)."""
    def linear(key, fan_in, fan_out, transposed=False):
        kw, kb = jax.random.split(key)
        bound = 1.0 / jnp.sqrt(jnp.float32(fan_in))
        shape = (fan_out, fan_in) if transposed else (fan_in, fan_out)
        w = jax.random.uniform(kw, shape, jnp.float32, -bound, bound)
        b = jax.random.uniform(kb, (1, fan_out), jnp.float32, -bound, bound)
        return w, b

    k1, k2, k3 = jax.random.split(key, 3)
    w1, b1 = linear(k1, state_dim, HIDDEN)            # (in, out)
    w2, b2 = linear(k2, HIDDEN, HIDDEN)               # (in, out)
    w3t, b3 = linear(k3, HIDDEN, 1, transposed=True)  # PyTorch layout (out=1, in=256)
    return {"w1": w1, "b1": b1, "w2": w2, "b2": b2, "w3t": w3t, "b3": b3}


def prepare_value_network_params(params, bf16_epilogue=None):
    """One-time cast of weights (and, on v6e/v7x, biases) to bf16 so the jitted
    forward emits no per-call cast kernels in front of the Pallas call."""
    if bf16_epilogue is None:
        bf16_epilogue = _DEVICE_INFO[1]
    bf = jnp.bfloat16
    ep = bf if bf16_epilogue else jnp.float32
    return {
        "w1": params["w1"].astype(bf),
        "b1": params["b1"].astype(ep),
        "w2": params["w2"].astype(bf),
        "b2": params["b2"].astype(ep),
        "w3t": params["w3t"].astype(bf),
        "b3": params["b3"].astype(jnp.float32),
    }


def value_network_ref(x, params):
    """Pure-JAX f32 reference (PyTorch semantics)."""
    h = jnp.maximum(x @ params["w1"] + params["b1"], 0.0)
    h = jnp.maximum(h @ params["w2"] + params["b2"], 0.0)
    return h @ params["w3t"].T + params["b3"]


def value_network_ref_kernel_math(x, params, bf16_epilogue):
    """Reference matching the kernel's bf16-MXU / epilogue-dtype math."""
    bf = jnp.bfloat16
    ep = bf if bf16_epilogue else jnp.float32
    h = jnp.dot(x.astype(bf), params["w1"].astype(bf),
                preferred_element_type=jnp.float32)
    h = jnp.maximum(h.astype(ep) + params["b1"].astype(ep), 0).astype(bf)
    h = jnp.dot(h, params["w2"].astype(bf), preferred_element_type=jnp.float32)
    h = jnp.maximum(h.astype(ep) + params["b2"].astype(ep), 0).astype(bf)
    return jnp.dot(h, params["w3t"].T.astype(bf),
                   preferred_element_type=jnp.float32) + params["b3"]


if __name__ == "__main__":
    key = jax.random.PRNGKey(0)
    k_param, k_x, k_x2 = jax.random.split(key, 3)

    state_dim = 8
    params = init_value_network_params(state_dim, k_param)
    prepared = prepare_value_network_params(params)
    bf16_ep = _DEVICE_INFO[1]

    # Small demo batch consistent with the module spec.
    batch = 2
    x = jax.random.normal(k_x, (batch, state_dim), jnp.float32)
    out = jax.block_until_ready(value_network_forward(x, prepared))
    assert out.shape == (batch, 1)
    assert jnp.allclose(out, value_network_ref_kernel_math(x, params, bf16_ep),
                        atol=2e-2, rtol=2e-2)
    assert jnp.allclose(out, value_network_ref(x, params), atol=1e-1, rtol=5e-2)

    # Ragged batch (padded tail) with the auto-chosen large tile.
    batch2 = 600
    x2 = jax.random.normal(k_x2, (batch2, state_dim), jnp.float32)
    out2 = jax.block_until_ready(value_network_forward(x2, prepared))
    assert out2.shape == (batch2, 1)
    assert jnp.allclose(out2, value_network_ref_kernel_math(x2, params, bf16_ep),
                        atol=2e-2, rtol=2e-2)

    # Force a multi-tile grid (>= 2 "parallel" steps) to exercise the pipeline.
    out3 = jax.block_until_ready(value_network_forward(x2, prepared, tb=256))
    assert out3.shape == (batch2, 1)
    assert jnp.allclose(out3, out2, atol=1e-5, rtol=1e-5)

    print("KERNEL_OK")
</pallas_src>

<mosaic_0001>
module attributes {stable_mosaic.version = 11 : i64} {
  func.func @_value_net_kernel(%arg0: i32, %arg1: memref<256x8xbf16, #tpu.memory_space<vmem>>, %arg2: memref<8x256xbf16, #tpu.memory_space<vmem>>, %arg3: memref<1x256xf32, #tpu.memory_space<vmem>>, %arg4: memref<256x256xbf16, #tpu.memory_space<vmem>>, %arg5: memref<1x256xf32, #tpu.memory_space<vmem>>, %arg6: memref<1x256xbf16, #tpu.memory_space<vmem>>, %arg7: memref<1x1xf32, #tpu.memory_space<vmem>>, %arg8: memref<1x256xf32, #tpu.memory_space<vmem>>) attributes {dimension_semantics = [#tpu.dimension_semantics<parallel>], iteration_bounds = array<i64: 1>, scalar_prefetch = 0 : i64, scratch_operands = 0 : i64, tpu.core_type = #tpu.core_type<tc>, window_params = [{transform_indices = @transform_0, window_bounds = array<i64: 256, 8>}, {pipeline_mode = #tpu.pipeline_mode<synchronous>, transform_indices = @transform_1, window_bounds = array<i64: 8, 256>}, {pipeline_mode = #tpu.pipeline_mode<synchronous>, transform_indices = @transform_2, window_bounds = array<i64: 1, 256>}, {pipeline_mode = #tpu.pipeline_mode<synchronous>, transform_indices = @transform_3, window_bounds = array<i64: 256, 256>}, {pipeline_mode = #tpu.pipeline_mode<synchronous>, transform_indices = @transform_4, window_bounds = array<i64: 1, 256>}, {pipeline_mode = #tpu.pipeline_mode<synchronous>, transform_indices = @transform_5, window_bounds = array<i64: 1, 256>}, {pipeline_mode = #tpu.pipeline_mode<synchronous>, transform_indices = @transform_6, window_bounds = array<i64: 1, 1>}, {transform_indices = @transform_7, window_bounds = array<i64: 1, 256>}]} {
    %c0 = arith.constant 0 : index
    %c0_0 = arith.constant 0 : index
    %0 = vector.load %arg1[%c0, %c0_0] : memref<256x8xbf16, #tpu.memory_space<vmem>>, vector<256x8xbf16>
    %c0_1 = arith.constant 0 : index
    %c0_2 = arith.constant 0 : index
    %1 = vector.load %arg2[%c0_1, %c0_2] : memref<8x256xbf16, #tpu.memory_space<vmem>>, vector<8x256xbf16>
    %cst = arith.constant dense<0.000000e+00> : vector<256x256xf32>
    %2 = tpu.matmul %0, %1, %cst {dimension_numbers = #tpu.dot_dimension_numbers<[1], [0], [0], [1], [0, 0, 1, 1], [], []>} : vector<256x8xbf16>, vector<8x256xbf16>, vector<256x256xf32> -> vector<256x256xf32>
    %c0_3 = arith.constant 0 : index
    %c0_4 = arith.constant 0 : index
    %3 = vector.load %arg3[%c0_3, %c0_4] : memref<1x256xf32, #tpu.memory_space<vmem>>, vector<1x256xf32>
    %4 = vector.broadcast %3 : vector<1x256xf32> to vector<256x256xf32>
    %5 = arith.addf %2, %4 : vector<256x256xf32>
    %cst_5 = arith.constant 0.000000e+00 : f32
    %6 = vector.broadcast %cst_5 : f32 to vector<256x256xf32>
    %7 = arith.maximumf %5, %6 : vector<256x256xf32>
    %8 = arith.truncf %7 : vector<256x256xf32> to vector<256x256xbf16>
    %c0_6 = arith.constant 0 : index
    %c0_7 = arith.constant 0 : index
    %9 = vector.load %arg4[%c0_6, %c0_7] : memref<256x256xbf16, #tpu.memory_space<vmem>>, vector<256x256xbf16>
    %cst_8 = arith.constant dense<0.000000e+00> : vector<256x256xf32>
    %10 = tpu.matmul %8, %9, %cst_8 {dimension_numbers = #tpu.dot_dimension_numbers<[1], [0], [0], [1], [0, 0, 1, 1], [], []>} : vector<256x256xbf16>, vector<256x256xbf16>, vector<256x256xf32> -> vector<256x256xf32>
    %c0_9 = arith.constant 0 : index
    %c0_10 = arith.constant 0 : index
    %11 = vector.load %arg5[%c0_9, %c0_10] : memref<1x256xf32, #tpu.memory_space<vmem>>, vector<1x256xf32>
    %12 = vector.broadcast %11 : vector<1x256xf32> to vector<256x256xf32>
    %13 = arith.addf %10, %12 : vector<256x256xf32>
    %cst_11 = arith.constant 0.000000e+00 : f32
    %14 = vector.broadcast %cst_11 : f32 to vector<256x256xf32>
    %15 = arith.maximumf %13, %14 : vector<256x256xf32>
    %16 = arith.truncf %15 : vector<256x256xf32> to vector<256x256xbf16>
    %c0_12 = arith.constant 0 : index
    %c0_13 = arith.constant 0 : index
    %17 = vector.load %arg6[%c0_12, %c0_13] : memref<1x256xbf16, #tpu.memory_space<vmem>>, vector<1x256xbf16>
    %cst_14 = arith.constant dense<0.000000e+00> : vector<1x256xf32>
    %18 = tpu.matmul %17, %16, %cst_14 {dimension_numbers = #tpu.dot_dimension_numbers<[1], [1], [0], [0], [0, 0, 1, 0], [], []>} : vector<1x256xbf16>, vector<256x256xbf16>, vector<1x256xf32> -> vector<1x256xf32>
    %c0_15 = arith.constant 0 : index
    %c0_16 = arith.constant 0 : index
    %19 = vector.load %arg7[%c0_15, %c0_16] : memref<1x1xf32, #tpu.memory_space<vmem>>, vector<1x1xf32>
    %20 = vector.broadcast %19 : vector<1x1xf32> to vector<1x256xf32>
    %21 = arith.addf %18, %20 : vector<1x256xf32>
    %c0_17 = arith.constant 0 : index
    %c0_18 = arith.constant 0 : index
    %22 = vector.load %arg8[%c0_17, %c0_18] : memref<1x256xf32, #tpu.memory_space<vmem>>, vector<1x256xf32>
    tpu.vector_store %arg8[%c0_17, %c0_18], %21 {strides = array<i32>} : memref<1x256xf32, #tpu.memory_space<vmem>>, vector<1x256xf32>,
    return
  }
  func.func @transform_0(%arg0: i32) -> (i32, i32) {
    %c0_i32 = arith.constant 0 : i32
    %c0_i32_0 = arith.constant 0 : i32
    return %arg0, %c0_i32 : i32, i32
  }
  func.func @transform_1(%arg0: i32) -> (i32, i32) {
    %c0_i32 = arith.constant 0 : i32
    %c0_i32_0 = arith.constant 0 : i32
    %c0_i32_1 = arith.constant 0 : i32
    return %c0_i32, %c0_i32_0 : i32, i32
  }
  func.func @transform_2(%arg0: i32) -> (i32, i32) {
    %c0_i32 = arith.constant 0 : i32
    %c0_i32_0 = arith.constant 0 : i32
    %c0_i32_1 = arith.constant 0 : i32
    return %c0_i32, %c0_i32_0 : i32, i32
  }
  func.func @transform_3(%arg0: i32) -> (i32, i32) {
    %c0_i32 = arith.constant 0 : i32
    %c0_i32_0 = arith.constant 0 : i32
    %c0_i32_1 = arith.constant 0 : i32
    return %c0_i32, %c0_i32_0 : i32, i32
  }
  func.func @transform_4(%arg0: i32) -> (i32, i32) {
    %c0_i32 = arith.constant 0 : i32
    %c0_i32_0 = arith.constant 0 : i32
    %c0_i32_1 = arith.constant 0 : i32
    return %c0_i32, %c0_i32_0 : i32, i32
  }
  func.func @transform_5(%arg0: i32) -> (i32, i32) {
    %c0_i32 = arith.constant 0 : i32
    %c0_i32_0 = arith.constant 0 : i32
    %c0_i32_1 = arith.constant 0 : i32
    return %c0_i32, %c0_i32_0 : i32, i32
  }
  func.func @transform_6(%arg0: i32) -> (i32, i32) {
    %c0_i32 = arith.constant 0 : i32
    %c0_i32_0 = arith.constant 0 : i32
    %c0_i32_1 = arith.constant 0 : i32
    return %c0_i32, %c0_i32_0 : i32, i32
  }
  func.func @transform_7(%arg0: i32) -> (i32, i32) {
    %c0_i32 = arith.constant 0 : i32
    %c0_i32_0 = arith.constant 0 : i32
    return %c0_i32, %arg0 : i32, i32
  }
}

</mosaic_0001>

<bundles_post_ra>
// kernel: _forward_jit.1
= control target key start
LH: loop header
LB: loop body
LE: loop exit
PB: predicated region body
PF: predicated region fallthrough
CT: control target
= control target key end

     0   :  { %s1599_s0 = inlined_call_operand.vmem [shape: bf16[256,8], index: 0, kind: input, shape index: {}]   ;;  %s1600_s1 = inlined_call_operand.vmem [shape: bf16[8,256], index: 1, kind: input, shape index: {}]   ;;  %s1601_s2 = inlined_call_operand.vmem [shape: f32[1,256], index: 2, kind: input, shape index: {}]   ;;  %s1602_s3 = inlined_call_operand.hbm [shape: bf16[256,256], index: 3, kind: input, shape index: {}]   ;;  %s1603_s4 = inlined_call_operand.vmem [shape: f32[1,256], index: 4, kind: input, shape index: {}]   ;;  %s1604_s5 = inlined_call_operand.vmem [shape: bf16[1,256], index: 5, kind: input, shape index: {}]   ;;  %s1605_s6 = inlined_call_operand.<no memory space> [shape: f32[1,1], index: 6, kind: input, shape index: {}]   ;;  %s1606_s7 = inlined_call_operand.vmem [shape: f32[1,256], index: 7, kind: output, shape index: {}]  }
   0x1   :  { %v12_v0 = vstv %s1605_s6 }
   0x2   :  { %13 = vst [vmem:[#allocation2] sm:$0x1] %v12_v0 }
   0x3   :  { %14 = vsyncpa [#allocation4], 0  ;;  %s1280_s26 = smov [#allocation3]   ;;  %s1256_s30 = scalar_lea.hbm %s1602_s3, 4096 }
   0x4   :  { %s26_s27 = sshll.u32 %s1280_s26, 4  ;;  %p1257_p0 = scmp.ne.s32.totalorder %s1602_s3, %s1256_s30  ;;  %s27_s27 = int_to_ptr.vmem [resolvable:$true] %s26_s27 }
   0x5   :  { %p1260_p1 = scmp.lt.u32.totalorder %s1256_s30, %s1602_s3 }
   0x7   :  { %p1262_p2 = pnand %p1260_p1, %p1257_p0 }
   0x9   :  { %1265 = shalt.err (!%p1262_p2)
}
   0xa   :  { %s1266_s6 = scalar_lea.vmem %s27_s27, 4096  ;;  %p1271_p4 = scmp.lt.s32.totalorder %s27_s27, %s27_s27 }
   0xb   :  { %p1267_p3 = scmp.ne.s32.totalorder %s27_s27, %s1266_s6  ;;  %p1272_p5 = scmp.lt.s32.totalorder %s1266_s6, %s1266_s6 }
   0xd   :  { %p1273_p6 = por %p1272_p5, %p1271_p4 }
   0xf   :  { %p1274_p7 = pnand %p1273_p6, %p1267_p3 }
  0x11   :  { %1277 = shalt.err (!%p1274_p7)
}
  0x12   :  { %s1281_s12 = smov 128   ;;  %s1282_s13 = smov 8  }
  0x13   :  { %32 = dma.hbm_to_vmem [thread:$0]  %s1602_s3, 4096, %s27_s27, [#allocation4], %s1281_s12, %s1281_s12, %s1282_s13  }
  0x14   :  { %1278 = dma.done.wait [#allocation4], 4096  }
  0x15   :  { %1279 = vsyncadd [#allocation4], 4294963200  ;;  %v1283_v1 = vmov 0   ;;  %v75_v2 = vld [vmem:[%s1600_s1] sm:$0xff]  ;;  %vm222_vm0 = vcmask 1043456   ;;  %vm173_vm1 = vcmask 64512   ;;  %v78_v54 = vlaneseq }
  0x16   :  { %261 = vmatprep.mubr.bf16.mxu0 %v1283_v1  ;;  %1189 = vset.pattern.permute.xlu0 %v1283_v1  ;;  %v1133_v3 = vcombine.high %v75_v2, %v75_v2  ;;  %v1132_v4 = vcombine.low %v75_v2, %v75_v2  ;;  %v1192_v6 = vld [vmem:[%s1599_s0] sm:$0xff]   ;;  %v1193_v7 = vld [vmem:[%s1599_s0 + $0x8] sm:$0xff]   ;;  %v1194_v11 = vld [vmem:[%s1599_s0 + $0x10] sm:$0xff]  }
  0x17   :  { %v1208_v8 = vld [vmem:[#allocation3 + $0x4] ss:$8 sps:$4 sm:$0xff]   ;;  %v1210_v9 = vld [vmem:[#allocation3] ss:$8 sps:$4 sm:$0xff]   ;;  %v1211_v10 = vld [vmem:[#allocation3 + $0x14] ss:$8 sps:$4 sm:$0xff]  }
  0x18   :  { %1134 = vmatprep.subr.msk.bf16.mxu0 %vm222_vm0, %v1133_v3  ;;  %v224_v5 = vsel %vm222_vm0, %v1132_v4, 0  ;;  %722 = vmatprep.subr.bf16.mxu1 %v1208_v8  ;;  %v1213_v12 = vld [vmem:[#allocation3 + $0x10] ss:$8 sps:$4 sm:$0xff]   ;;  %v1214_v13 = vld [vmem:[#allocation3 + $0x24] ss:$8 sps:$4 sm:$0xff]   ;;  %v1425_v55 = vshrl.u32 %v78_v54, 7 }
  0x19   :  { %230 = vmatpush1.bf16.msra.mxu0 %v224_v5  ;;  %723 = vmatpush1.bf16.msra.mxu1 %v1210_v9  ;;  %v1216_v14 = vld [vmem:[#allocation3 + $0x20] ss:$8 sps:$4 sm:$0xff]   ;;  %v1217_v15 = vld [vmem:[#allocation3 + $0x34] ss:$8 sps:$4 sm:$0xff]   ;;  %v1219_v17 = vld [vmem:[#allocation3 + $0x30] ss:$8 sps:$4 sm:$0xff]  }
  0x1a   :  { %724 = vmatprep.subr.bf16.mxu1 %v1211_v10  ;;  %v1195_v16 = vld [vmem:[%s1599_s0 + $0x18] sm:$0xff]   ;;  %v1220_v18 = vld [vmem:[#allocation3 + $0x44] ss:$8 sps:$4 sm:$0xff]   ;;  %v1222_v19 = vld [vmem:[#allocation3 + $0x40] ss:$8 sps:$4 sm:$0xff]   ;;  %v1428_v56 = vsub.s32 0, %v1425_v55 }
  0x1b   :  { %v1223_v20 = vld [vmem:[#allocation3 + $0x54] ss:$8 sps:$4 sm:$0xff]   ;;  %v1225_v22 = vld [vmem:[#allocation3 + $0x50] ss:$8 sps:$4 sm:$0xff]   ;;  %v1226_v23 = vld [vmem:[#allocation3 + $0x64] ss:$8 sps:$4 sm:$0xff]  }
  0x1c   :  { %1135 = vmatmul.mubr.msk.bf16.vlgmr.msra.gmra.mrb[0].mxu0 %vm173_vm1, %v1192_v6  ;;  %v1196_v21 = vld [vmem:[%s1599_s0 + $0x20] sm:$0xff]   ;;  %v1197_v26 = vld [vmem:[%s1599_s0 + $0x28] sm:$0xff]   ;;  %v1231_v27 = vld [vmem:[#allocation3 + $0x70] ss:$8 sps:$4 sm:$0xff]   ;;  %v84_v58 = vsub.s32 1, %v1425_v55  ;;  %vm1108_vm2 = vcmp.lt.s32.totalorder %v78_v54, 256 }
  0x1d   :  { %271 = vmatprep.mubr.bf16.mxu0 %v1283_v1  ;;  %725 = vmatpush1.bf16.msra.mxu1 %v1213_v12  ;;  %v1228_v24 = vld [vmem:[#allocation3 + $0x60] ss:$8 sps:$4 sm:$0xff]   ;;  %v1229_v25 = vld [vmem:[#allocation3 + $0x74] ss:$8 sps:$4 sm:$0xff]   ;;  %v1232_v28 = vld [vmem:[#allocation3 + $0x84] ss:$8 sps:$4 sm:$0xff]  }
  0x1e   :  { %726 = vmatprep.subr.bf16.mxu1 %v1214_v13  ;;  %v1234_v29 = vld [vmem:[#allocation3 + $0x80] ss:$8 sps:$4 sm:$0xff]   ;;  %v1235_v30 = vld [vmem:[#allocation3 + $0x94] ss:$8 sps:$4 sm:$0xff]   ;;  %v1237_v32 = vld [vmem:[#allocation3 + $0x90] ss:$8 sps:$4 sm:$0xff]  }
  0x1f   :  { %v1198_v31 = vld [vmem:[%s1599_s0 + $0x30] sm:$0xff]   ;;  %v1240_v34 = vld [vmem:[#allocation3 + $0xa0] ss:$8 sps:$4 sm:$0xff]   ;;  %v1199_v36 = vld [vmem:[%s1599_s0 + $0x38] sm:$0xff]  }
  0x20   :  { %v1238_v33 = vld [vmem:[#allocation3 + $0xa4] ss:$8 sps:$4 sm:$0xff]   ;;  %v1241_v35 = vld [vmem:[#allocation3 + $0xb4] ss:$8 sps:$4 sm:$0xff]   ;;  %v1243_v37 = vld [vmem:[#allocation3 + $0xb0] ss:$8 sps:$4 sm:$0xff]  }
  0x21   :  { %727 = vmatpush1.bf16.msra.mxu1 %v1216_v14  ;;  %v1244_v38 = vld [vmem:[#allocation3 + $0xc4] ss:$8 sps:$4 sm:$0xff]   ;;  %v1246_v39 = vld [vmem:[#allocation3 + $0xc0] ss:$8 sps:$4 sm:$0xff]   ;;  %v1247_v40 = vld [vmem:[#allocation3 + $0xd4] ss:$8 sps:$4 sm:$0xff]  }
  0x22   :  { %728 = vmatprep.subr.bf16.mxu1 %v1217_v15  ;;  %v1200_v41 = vld [vmem:[%s1599_s0 + $0x40] sm:$0xff]   ;;  %v1201_v42 = vld [vmem:[%s1599_s0 + $0x48] sm:$0xff]   ;;  %v1202_v43 = vld [vmem:[%s1599_s0 + $0x50] sm:$0xff]  }
  0x23   :  { %v1249_v44 = vld [vmem:[#allocation3 + $0xd0] ss:$8 sps:$4 sm:$0xff]   ;;  %v1250_v46 = vld [vmem:[#allocation3 + $0xe4] ss:$8 sps:$4 sm:$0xff]   ;;  %v1252_v47 = vld [vmem:[#allocation3 + $0xe0] ss:$8 sps:$4 sm:$0xff]  }
  0x24   :  { %1136 = vmatmul.mubr.msk.bf16.gmra.mrb[4].mxu0 %vm173_vm1, %v1193_v7  ;;  %v1203_v45 = vld [vmem:[%s1599_s0 + $0x58] sm:$0xff]   ;;  %v1204_v50 = vld [vmem:[%s1599_s0 + $0x60] sm:$0xff]   ;;  %v1205_v51 = vld [vmem:[%s1599_s0 + $0x68] sm:$0xff]  }
  0x25   :  { %281 = vmatprep.mubr.bf16.mxu0 %v1283_v1  ;;  %729 = vmatpush1.bf16.msra.mxu1 %v1219_v17  ;;  %v1253_v48 = vld [vmem:[#allocation3 + $0xf4] ss:$8 sps:$4 sm:$0xff]   ;;  %v1255_v49 = vld [vmem:[#allocation3 + $0xf0] ss:$8 sps:$4 sm:$0xff]  }
  0x26   :  { %730 = vmatprep.subr.bf16.mxu1 %v1220_v18  ;;  %v1206_v52 = vld [vmem:[%s1599_s0 + $0x70] sm:$0xff]   ;;  %v1207_v53 = vld [vmem:[%s1599_s0 + $0x78] sm:$0xff]   ;;  %v76_v57 = vld [vmem:[%s1601_s2] sm:$0x3] }
  0x27   :  { %v1435_v59 = vrot.slane %v76_v57, %v1428_v56  ;;  %v1439_v60 = vrot.slane %v76_v57, %v84_v58 }
  0x29   :  { %731 = vmatpush1.bf16.msra.mxu1 %v1222_v19 }
  0x2a   :  { %732 = vmatprep.subr.bf16.mxu1 %v1223_v20 }
  0x2c   :  { %1137 = vmatmul.mubr.msk.bf16.gmra.mrb[8].mxu0 %vm173_vm1, %v1194_v11 }
  0x2d   :  { %291 = vmatprep.mubr.bf16.mxu0 %v1283_v1  ;;  %733 = vmatpush1.bf16.msra.mxu1 %v1225_v22 }
  0x2e   :  { %734 = vmatprep.subr.bf16.mxu1 %v1226_v23 }
  0x31   :  { %735 = vmatpush1.bf16.msra.mxu1 %v1228_v24 }
  0x32   :  { %736 = vmatprep.subr.bf16.mxu1 %v1229_v25 }
  0x34   :  { %1138 = vmatmul.mubr.msk.bf16.gmra.mrb[12].mxu0 %vm173_vm1, %v1195_v16 }
  0x35   :  { %301 = vmatprep.mubr.bf16.mxu0 %v1283_v1  ;;  %737 = vmatpush1.bf16.msra.mxu1 %v1231_v27 }
  0x36   :  { %738 = vmatprep.subr.bf16.mxu1 %v1232_v28 }
  0x39   :  { %739 = vmatpush1.bf16.msra.mxu1 %v1234_v29 }
  0x3a   :  { %740 = vmatprep.subr.bf16.mxu1 %v1235_v30 }
  0x3c   :  { %1139 = vmatmul.mubr.msk.bf16.gmra.mrb[16].mxu0 %vm173_vm1, %v1196_v21 }
  0x3d   :  { %311 = vmatprep.mubr.bf16.mxu0 %v1283_v1  ;;  %741 = vmatpush1.bf16.msra.mxu1 %v1237_v32 }
  0x3e   :  { %742 = vmatprep.subr.bf16.mxu1 %v1238_v33 }
  0x41   :  { %743 = vmatpush1.bf16.msra.mxu1 %v1240_v34 }
  0x42   :  { %744 = vmatprep.subr.bf16.mxu1 %v1241_v35 }
  0x44   :  { %1140 = vmatmul.mubr.msk.bf16.gmra.mrb[20].mxu0 %vm173_vm1, %v1197_v26 }
  0x45   :  { %321 = vmatprep.mubr.bf16.mxu0 %v1283_v1  ;;  %745 = vmatpush1.bf16.msra.mxu1 %v1243_v37 }
  0x46   :  { %746 = vmatprep.subr.bf16.mxu1 %v1244_v38 }
  0x49   :  { %747 = vmatpush1.bf16.msra.mxu1 %v1246_v39 }
  0x4a   :  { %748 = vmatprep.subr.bf16.mxu1 %v1247_v40 }
  0x4c   :  { %1141 = vmatmul.mubr.msk.bf16.gmra.mrb[24].mxu0 %vm173_vm1, %v1198_v31 }
  0x4d   :  { %331 = vmatprep.mubr.bf16.mxu0 %v1283_v1  ;;  %749 = vmatpush1.bf16.msra.mxu1 %v1249_v44 }
  0x4e   :  { %750 = vmatprep.subr.bf16.mxu1 %v1250_v46 }
  0x51   :  { %751 = vmatpush1.bf16.msra.mxu1 %v1252_v47 }
  0x52   :  { %752 = vmatprep.subr.bf16.mxu1 %v1253_v48 }
  0x54   :  { %1142 = vmatmul.mubr.msk.bf16.gmra.mrb[28].mxu0 %vm173_vm1, %v1199_v36 }
  0x55   :  { %341 = vmatprep.mubr.bf16.mxu0 %v1283_v1  ;;  %753 = vmatpush1.bf16.msra.mxu1 %v1255_v49 }
  0x5c   :  { %1143 = vmatmul.mubr.msk.bf16.gmra.mrb[32].mxu0 %vm173_vm1, %v1200_v41 }
  0x5d   :  { %351 = vmatprep.mubr.bf16.mxu0 %v1283_v1 }
  0x64   :  { %1144 = vmatmul.mubr.msk.bf16.gmra.mrb[36].mxu0 %vm173_vm1, %v1201_v42 }
  0x65   :  { %361 = vmatprep.mubr.bf16.mxu0 %v1283_v1 }
  0x6c   :  { %1145 = vmatmul.mubr.msk.bf16.gmra.mrb[40].mxu0 %vm173_vm1, %v1202_v43 }
  0x6d   :  { %371 = vmatprep.mubr.bf16.mxu0 %v1283_v1 }
  0x74   :  { %1146 = vmatmul.mubr.msk.bf16.gmra.mrb[44].mxu0 %vm173_vm1, %v1203_v45 }
  0x75   :  { %381 = vmatprep.mubr.bf16.mxu0 %v1283_v1 }
  0x7c   :  { %1147 = vmatmul.mubr.msk.bf16.gmra.mrb[48].mxu0 %vm173_vm1, %v1204_v50 }
  0x7d   :  { %391 = vmatprep.mubr.bf16.mxu0 %v1283_v1 }
  0x84   :  { %1148 = vmatmul.mubr.msk.bf16.gmra.mrb[52].mxu0 %vm173_vm1, %v1205_v51 }
  0x85   :  { %401 = vmatprep.mubr.bf16.mxu0 %v1283_v1 }
  0x8c   :  { %1149 = vmatmul.mubr.msk.bf16.gmra.mrb[56].mxu0 %vm173_vm1, %v1206_v52 }
  0x8d   :  { %411 = vmatprep.mubr.bf16.mxu0 %v1283_v1 }
  0x94   :  { %1150 = vmatmul.mubr.msk.bf16.gmra.mrb[60].mxu0 %vm173_vm1, %v1207_v53 }
  0xef   :  { %v263_v61 = vpop.f32.mrb[0].mxu0 }
  0xf0   :  { %v264_v62 = vadd.f32 %v263_v61, %v1435_v59  ;;  %v265_v63 = vpop.f32.mrb[1].mxu0 }
  0xf1   :  { %v266_v0 = vadd.f32 %v265_v63, %v1439_v60  ;;  %v267_v1 = vpop.f32.mrb[2].mxu0 }
  0xf2   :  { %v268_v2 = vadd.f32 %v267_v1, %v1435_v59  ;;  %v269_v3 = vpop.f32.mrb[3].mxu0  ;;  %v422_v5 = vmax.f32 %v264_v62, 0.0 }
  0xf3   :  { %v270_v4 = vadd.f32 %v269_v3, %v1439_v60  ;;  %v423_v7 = vmax.f32 %v266_v0, 0.0 }
  0xf4   :  { %v424_v6 = vmax.f32 %v268_v2, 0.0 }
  0xf5   :  { %v425_v8 = vmax.f32 %v270_v4, 0.0 }
  0xf6   :  { %v486_v9 = vpack.c.bf16 %v424_v6, %v422_v5 }
  0xf7   :  { %v273_v10 = vpop.f32.mrb[4].mxu0  ;;  %v487_v11 = vpack.c.bf16 %v425_v8, %v423_v7 }
  0xf8   :  { %v274_v12 = vadd.f32 %v273_v10, %v1435_v59  ;;  %v275_v13 = vpop.f32.mrb[5].mxu0 }
  0xf9   :  { %v276_v14 = vadd.f32 %v275_v13, %v1439_v60  ;;  %v277_v15 = vpop.f32.mrb[6].mxu0  ;;  %754 = vmatprep.mubr.bf16.mxu1 %v487_v11 }
  0xfa   :  { %v278_v16 = vadd.f32 %v277_v15, %v1435_v59  ;;  %v279_v17 = vpop.f32.mrb[7].mxu0  ;;  %755 = vmatmul.mubr.bf16.vlgmr.msra.gmra.mrb[0].mxu1 %v486_v9  ;;  %v426_v19 = vmax.f32 %v274_v12, 0.0 }
  0xfb   :  { %v280_v18 = vadd.f32 %v279_v17, %v1439_v60  ;;  %v427_v21 = vmax.f32 %v276_v14, 0.0 }
  0xfc   :  { %v428_v20 = vmax.f32 %v278_v16, 0.0 }
  0xfd   :  { %v429_v22 = vmax.f32 %v280_v18, 0.0 }
  0xfe   :  { %v488_v23 = vpack.c.bf16 %v428_v20, %v426_v19 }
  0xff   :  { %v489_v24 = vpack.c.bf16 %v429_v22, %v427_v21  ;;  %v283_v25 = vpop.f32.mrb[8].mxu0 }
 0x100   :  { %v284_v26 = vadd.f32 %v283_v25, %v1435_v59  ;;  %v285_v27 = vpop.f32.mrb[9].mxu0 }
 0x101   :  { %v286_v28 = vadd.f32 %v285_v27, %v1439_v60  ;;  %v287_v29 = vpop.f32.mrb[10].mxu0  ;;  %764 = vmatprep.mubr.bf16.mxu1 %v489_v24 }
 0x102   :  { %v288_v30 = vadd.f32 %v287_v29, %v1435_v59  ;;  %v289_v31 = vpop.f32.mrb[11].mxu0  ;;  %765 = vmatmul.mubr.bf16.gmra.mrb[4].mxu1 %v488_v23  ;;  %v430_v33 = vmax.f32 %v284_v26, 0.0 }
 0x103   :  { %v290_v32 = vadd.f32 %v289_v31, %v1439_v60  ;;  %v431_v35 = vmax.f32 %v286_v28, 0.0 }
 0x104   :  { %v432_v34 = vmax.f32 %v288_v30, 0.0 }
 0x105   :  { %v433_v36 = vmax.f32 %v290_v32, 0.0 }
 0x106   :  { %v490_v37 = vpack.c.bf16 %v432_v34, %v430_v33 }
 0x107   :  { %v491_v38 = vpack.c.bf16 %v433_v36, %v431_v35  ;;  %v293_v39 = vpop.f32.mrb[12].mxu0 }
 0x108   :  { %v294_v40 = vadd.f32 %v293_v39, %v1435_v59  ;;  %v295_v41 = vpop.f32.mrb[13].mxu0 }
 0x109   :  { %v296_v42 = vadd.f32 %v295_v41, %v1439_v60  ;;  %v297_v43 = vpop.f32.mrb[14].mxu0  ;;  %774 = vmatprep.mubr.bf16.mxu1 %v491_v38 }
 0x10a   :  { %v298_v44 = vadd.f32 %v297_v43, %v1435_v59  ;;  %v299_v45 = vpop.f32.mrb[15].mxu0  ;;  %775 = vmatmul.mubr.bf16.gmra.mrb[8].mxu1 %v490_v37  ;;  %v434_v47 = vmax.f32 %v294_v40, 0.0 }
 0x10b   :  { %v300_v46 = vadd.f32 %v299_v45, %v1439_v60  ;;  %v435_v49 = vmax.f32 %v296_v42, 0.0 }
 0x10c   :  { %v436_v48 = vmax.f32 %v298_v44, 0.0 }
 0x10d   :  { %v437_v50 = vmax.f32 %v300_v46, 0.0 }
 0x10e   :  { %v492_v51 = vpack.c.bf16 %v436_v48, %v434_v47 }
 0x10f   :  { %v493_v52 = vpack.c.bf16 %v437_v50, %v435_v49  ;;  %v303_v53 = vpop.f32.mrb[16].mxu0 }
 0x110   :  { %v304_v57 = vadd.f32 %v303_v53, %v1435_v59  ;;  %v305_v61 = vpop.f32.mrb[17].mxu0 }
 0x111   :  { %v306_v62 = vadd.f32 %v305_v61, %v1439_v60  ;;  %v307_v63 = vpop.f32.mrb[18].mxu0  ;;  %784 = vmatprep.mubr.bf16.mxu1 %v493_v52 }
 0x112   :  { %v308_v0 = vadd.f32 %v307_v63, %v1435_v59  ;;  %v309_v1 = vpop.f32.mrb[19].mxu0  ;;  %785 = vmatmul.mubr.bf16.gmra.mrb[12].mxu1 %v492_v51  ;;  %v438_v3 = vmax.f32 %v304_v57, 0.0 }
 0x113   :  { %v310_v2 = vadd.f32 %v309_v1, %v1439_v60  ;;  %v439_v5 = vmax.f32 %v306_v62, 0.0 }
 0x114   :  { %v440_v4 = vmax.f32 %v308_v0, 0.0 }
 0x115   :  { %v441_v6 = vmax.f32 %v310_v2, 0.0 }
 0x116   :  { %v494_v7 = vpack.c.bf16 %v440_v4, %v438_v3 }
 0x117   :  { %v495_v8 = vpack.c.bf16 %v441_v6, %v439_v5  ;;  %v313_v9 = vpop.f32.mrb[20].mxu0 }
 0x118   :  { %v314_v10 = vadd.f32 %v313_v9, %v1435_v59  ;;  %v315_v11 = vpop.f32.mrb[21].mxu0 }
 0x119   :  { %v316_v12 = vadd.f32 %v315_v11, %v1439_v60  ;;  %v317_v13 = vpop.f32.mrb[22].mxu0  ;;  %794 = vmatprep.mubr.bf16.mxu1 %v495_v8 }
 0x11a   :  { %v318_v14 = vadd.f32 %v317_v13, %v1435_v59  ;;  %v319_v15 = vpop.f32.mrb[23].mxu0  ;;  %795 = vmatmul.mubr.bf16.gmra.mrb[16].mxu1 %v494_v7  ;;  %v442_v17 = vmax.f32 %v314_v10, 0.0 }
 0x11b   :  { %v320_v16 = vadd.f32 %v319_v15, %v1439_v60  ;;  %v443_v19 = vmax.f32 %v316_v12, 0.0 }
 0x11c   :  { %v444_v18 = vmax.f32 %v318_v14, 0.0 }
 0x11d   :  { %v445_v20 = vmax.f32 %v320_v16, 0.0 }
 0x11e   :  { %v496_v21 = vpack.c.bf16 %v444_v18, %v442_v17 }
 0x11f   :  { %v497_v22 = vpack.c.bf16 %v445_v20, %v443_v19  ;;  %v323_v23 = vpop.f32.mrb[24].mxu0 }
 0x120   :  { %v324_v24 = vadd.f32 %v323_v23, %v1435_v59  ;;  %v325_v25 = vpop.f32.mrb[25].mxu0 }
 0x121   :  { %v326_v26 = vadd.f32 %v325_v25, %v1439_v60  ;;  %v327_v27 = vpop.f32.mrb[26].mxu0  ;;  %804 = vmatprep.mubr.bf16.mxu1 %v497_v22 }
 0x122   :  { %v328_v28 = vadd.f32 %v327_v27, %v1435_v59  ;;  %v329_v29 = vpop.f32.mrb[27].mxu0  ;;  %805 = vmatmul.mubr.bf16.gmra.mrb[20].mxu1 %v496_v21  ;;  %v446_v31 = vmax.f32 %v324_v24, 0.0 }
 0x123   :  { %v330_v30 = vadd.f32 %v329_v29, %v1439_v60  ;;  %v447_v33 = vmax.f32 %v326_v26, 0.0 }
 0x124   :  { %v448_v32 = vmax.f32 %v328_v28, 0.0 }
 0x125   :  { %v449_v34 = vmax.f32 %v330_v30, 0.0 }
 0x126   :  { %v498_v35 = vpack.c.bf16 %v448_v32, %v446_v31 }
 0x127   :  { %v499_v36 = vpack.c.bf16 %v449_v34, %v447_v33  ;;  %v333_v37 = vpop.f32.mrb[28].mxu0 }
 0x128   :  { %v334_v38 = vadd.f32 %v333_v37, %v1435_v59  ;;  %v335_v39 = vpop.f32.mrb[29].mxu0 }
 0x129   :  { %v336_v40 = vadd.f32 %v335_v39, %v1439_v60  ;;  %v337_v41 = vpop.f32.mrb[30].mxu0  ;;  %814 = vmatprep.mubr.bf16.mxu1 %v499_v36 }
 0x12a   :  { %v338_v42 = vadd.f32 %v337_v41, %v1435_v59  ;;  %v339_v43 = vpop.f32.mrb[31].mxu0  ;;  %815 = vmatmul.mubr.bf16.gmra.mrb[24].mxu1 %v498_v35  ;;  %v450_v45 = vmax.f32 %v334_v38, 0.0 }
 0x12b   :  { %v340_v44 = vadd.f32 %v339_v43, %v1439_v60  ;;  %v451_v47 = vmax.f32 %v336_v40, 0.0 }
 0x12c   :  { %v452_v46 = vmax.f32 %v338_v42, 0.0 }
 0x12d   :  { %v453_v48 = vmax.f32 %v340_v44, 0.0 }
 0x12e   :  { %v500_v49 = vpack.c.bf16 %v452_v46, %v450_v45 }
 0x12f   :  { %v501_v50 = vpack.c.bf16 %v453_v48, %v451_v47  ;;  %v343_v51 = vpop.f32.mrb[32].mxu0 }
 0x130   :  { %v344_v52 = vadd.f32 %v343_v51, %v1435_v59  ;;  %v345_v53 = vpop.f32.mrb[33].mxu0 }
 0x131   :  { %v346_v57 = vadd.f32 %v345_v53, %v1439_v60  ;;  %v347_v61 = vpop.f32.mrb[34].mxu0  ;;  %824 = vmatprep.mubr.bf16.mxu1 %v501_v50 }
 0x132   :  { %v348_v62 = vadd.f32 %v347_v61, %v1435_v59  ;;  %v349_v63 = vpop.f32.mrb[35].mxu0  ;;  %825 = vmatmul.mubr.bf16.gmra.mrb[28].mxu1 %v500_v49  ;;  %v454_v1 = vmax.f32 %v344_v52, 0.0 }
 0x133   :  { %v350_v0 = vadd.f32 %v349_v63, %v1439_v60  ;;  %v455_v3 = vmax.f32 %v346_v57, 0.0 }
 0x134   :  { %v456_v2 = vmax.f32 %v348_v62, 0.0 }
 0x135   :  { %v457_v4 = vmax.f32 %v350_v0, 0.0 }
 0x136   :  { %v502_v5 = vpack.c.bf16 %v456_v2, %v454_v1 }
 0x137   :  { %v503_v6 = vpack.c.bf16 %v457_v4, %v455_v3  ;;  %v353_v7 = vpop.f32.mrb[36].mxu0 }
 0x138   :  { %v354_v8 = vadd.f32 %v353_v7, %v1435_v59  ;;  %v355_v9 = vpop.f32.mrb[37].mxu0 }
 0x139   :  { %v356_v10 = vadd.f32 %v355_v9, %v1439_v60  ;;  %v357_v11 = vpop.f32.mrb[38].mxu0  ;;  %834 = vmatprep.mubr.bf16.mxu1 %v503_v6 }
 0x13a   :  { %v358_v12 = vadd.f32 %v357_v11, %v1435_v59  ;;  %v359_v13 = vpop.f32.mrb[39].mxu0  ;;  %835 = vmatmul.mubr.bf16.gmra.mrb[32].mxu1 %v502_v5  ;;  %v458_v15 = vmax.f32 %v354_v8, 0.0 }
 0x13b   :  { %v360_v14 = vadd.f32 %v359_v13, %v1439_v60  ;;  %v459_v17 = vmax.f32 %v356_v10, 0.0 }
 0x13c   :  { %v460_v16 = vmax.f32 %v358_v12, 0.0 }
 0x13d   :  { %v461_v18 = vmax.f32 %v360_v14, 0.0 }
 0x13e   :  { %v504_v19 = vpack.c.bf16 %v460_v16, %v458_v15 }
 0x13f   :  { %v505_v20 = vpack.c.bf16 %v461_v18, %v459_v17  ;;  %v363_v21 = vpop.f32.mrb[40].mxu0 }
 0x140   :  { %v364_v22 = vadd.f32 %v363_v21, %v1435_v59  ;;  %v365_v23 = vpop.f32.mrb[41].mxu0 }
 0x141   :  { %v366_v24 = vadd.f32 %v365_v23, %v1439_v60  ;;  %v367_v25 = vpop.f32.mrb[42].mxu0  ;;  %844 = vmatprep.mubr.bf16.mxu1 %v505_v20 }
 0x142   :  { %v368_v26 = vadd.f32 %v367_v25, %v1435_v59  ;;  %v369_v27 = vpop.f32.mrb[43].mxu0  ;;  %845 = vmatmul.mubr.bf16.gmra.mrb[36].mxu1 %v504_v19  ;;  %v462_v29 = vmax.f32 %v364_v22, 0.0 }
 0x143   :  { %v370_v28 = vadd.f32 %v369_v27, %v1439_v60  ;;  %v463_v31 = vmax.f32 %v366_v24, 0.0 }
 0x144   :  { %v464_v30 = vmax.f32 %v368_v26, 0.0 }
 0x145   :  { %v465_v32 = vmax.f32 %v370_v28, 0.0 }
 0x146   :  { %v506_v33 = vpack.c.bf16 %v464_v30, %v462_v29 }
 0x147   :  { %v507_v34 = vpack.c.bf16 %v465_v32, %v463_v31  ;;  %v373_v35 = vpop.f32.mrb[44].mxu0 }
 0x148   :  { %v374_v36 = vadd.f32 %v373_v35, %v1435_v59  ;;  %v375_v37 = vpop.f32.mrb[45].mxu0 }
 0x149   :  { %v376_v38 = vadd.f32 %v375_v37, %v1439_v60  ;;  %v377_v39 = vpop.f32.mrb[46].mxu0  ;;  %854 = vmatprep.mubr.bf16.mxu1 %v507_v34 }
 0x14a   :  { %v378_v40 = vadd.f32 %v377_v39, %v1435_v59  ;;  %v379_v41 = vpop.f32.mrb[47].mxu0  ;;  %855 = vmatmul.mubr.bf16.gmra.mrb[40].mxu1 %v506_v33  ;;  %v466_v43 = vmax.f32 %v374_v36, 0.0 }
 0x14b   :  { %v380_v42 = vadd.f32 %v379_v41, %v1439_v60  ;;  %v467_v45 = vmax.f32 %v376_v38, 0.0 }
 0x14c   :  { %v468_v44 = vmax.f32 %v378_v40, 0.0 }
 0x14d   :  { %v469_v46 = vmax.f32 %v380_v42, 0.0 }
 0x14e   :  { %v508_v47 = vpack.c.bf16 %v468_v44, %v466_v43 }
 0x14f   :  { %v509_v48 = vpack.c.bf16 %v469_v46, %v467_v45  ;;  %v383_v49 = vpop.f32.mrb[48].mxu0 }
 0x150   :  { %v384_v50 = vadd.f32 %v383_v49, %v1435_v59  ;;  %v385_v51 = vpop.f32.mrb[49].mxu0 }
 0x151   :  { %v386_v52 = vadd.f32 %v385_v51, %v1439_v60  ;;  %v387_v53 = vpop.f32.mrb[50].mxu0  ;;  %864 = vmatprep.mubr.bf16.mxu1 %v509_v48  ;;  %v1284_v51 = vmov 1966171168  }
 0x152   :  { %v388_v57 = vadd.f32 %v387_v53, %v1435_v59  ;;  %v389_v61 = vpop.f32.mrb[51].mxu0  ;;  %865 = vmatmul.mubr.bf16.gmra.mrb[44].mxu1 %v508_v47  ;;  %v470_v63 = vmax.f32 %v384_v50, 0.0  ;;  %v550_v47 = vld [vmem:[%s1603_s4] sm:$0x3] }
 0x153   :  { %v390_v62 = vadd.f32 %v389_v61, %v1439_v60  ;;  %v471_v1 = vmax.f32 %v386_v52, 0.0  ;;  %v1509_v48 = vrot.slane %v550_v47, %v1428_v56  ;;  %v1032_v52 = vunpack.c.l.s4 %v1284_v51 }
 0x154   :  { %v472_v0 = vmax.f32 %v388_v57, 0.0 }
 0x155   :  { %v473_v2 = vmax.f32 %v390_v62, 0.0 }
 0x156   :  { %v510_v3 = vpack.c.bf16 %v472_v0, %v470_v63  ;;  %v1521_v63 = vld.sshfl [vmem:[%s1604_s5] sm:$0x11 pattern:$0x75316420]  ;;  %v1033_v0 = vunpack.c.0.s8 %v1032_v52 }
 0x157   :  { %v511_v4 = vpack.c.bf16 %v473_v2, %v471_v1  ;;  %v393_v5 = vpop.f32.mrb[52].mxu0  ;;  %v1030_v1 = vcombine.high %v1521_v63, %v1521_v63 }
 0x158   :  { %v394_v6 = vadd.f32 %v393_v5, %v1435_v59  ;;  %v395_v7 = vpop.f32.mrb[53].mxu0 }
 0x159   :  { %v396_v8 = vadd.f32 %v395_v7, %v1439_v60  ;;  %v397_v9 = vpop.f32.mrb[54].mxu0  ;;  %874 = vmatprep.mubr.bf16.mxu1 %v511_v4  ;;  %v1527_v4 = vsub.s32 %v1033_v0, %v1425_v55 }
 0x15a   :  { %v398_v10 = vadd.f32 %v397_v9, %v1435_v59  ;;  %v399_v11 = vpop.f32.mrb[55].mxu0  ;;  %875 = vmatmul.mubr.bf16.gmra.mrb[48].mxu1 %v510_v3  ;;  %v474_v13 = vmax.f32 %v394_v6, 0.0 }
 0x15b   :  { %v400_v12 = vadd.f32 %v399_v11, %v1439_v60  ;;  %v475_v15 = vmax.f32 %v396_v8, 0.0  ;;  %v1044_v8 = vrot.slane %v1030_v1, %v1527_v4 }
 0x15c   :  { %v476_v14 = vmax.f32 %v398_v10, 0.0 }
 0x15d   :  { %v477_v16 = vmax.f32 %v400_v12, 0.0  ;;  %1079 = vmatprep.mubr.bf16.mxu0 %v1044_v8 }
 0x15e   :  { %v512_v17 = vpack.c.bf16 %v476_v14, %v474_v13 }
 0x15f   :  { %v513_v18 = vpack.c.bf16 %v477_v16, %v475_v15  ;;  %v403_v19 = vpop.f32.mrb[56].mxu0  ;;  %v1012_v15 = vld [vmem:[#allocation2] sm:$0x1] }
 0x160   :  { %v404_v20 = vadd.f32 %v403_v19, %v1435_v59  ;;  %v405_v21 = vpop.f32.mrb[57].mxu0  ;;  %1015 = vperm.xlu0 %1189, %v1012_v15  }
 0x161   :  { %v406_v22 = vadd.f32 %v405_v21, %v1439_v60  ;;  %v407_v23 = vpop.f32.mrb[58].mxu0  ;;  %884 = vmatprep.mubr.bf16.mxu1 %v513_v18 }
 0x162   :  { %v408_v24 = vadd.f32 %v407_v23, %v1435_v59  ;;  %v409_v25 = vpop.f32.mrb[59].mxu0  ;;  %885 = vmatmul.mubr.bf16.gmra.mrb[52].mxu1 %v512_v17  ;;  %v478_v27 = vmax.f32 %v404_v20, 0.0 }
 0x163   :  { %v410_v26 = vadd.f32 %v409_v25, %v1439_v60  ;;  %v479_v29 = vmax.f32 %v406_v22, 0.0 }
 0x164   :  { %v480_v28 = vmax.f32 %v408_v24, 0.0 }
 0x165   :  { %v481_v30 = vmax.f32 %v410_v26, 0.0 }
 0x166   :  { %v514_v31 = vpack.c.bf16 %v480_v28, %v478_v27 }
 0x167   :  { %v515_v32 = vpack.c.bf16 %v481_v30, %v479_v29  ;;  %v413_v33 = vpop.f32.mrb[60].mxu0 }
 0x168   :  { %v414_v34 = vadd.f32 %v413_v33, %v1435_v59  ;;  %v415_v35 = vpop.f32.mrb[61].mxu0 }
 0x169   :  { %v416_v36 = vadd.f32 %v415_v35, %v1439_v60  ;;  %v417_v37 = vpop.f32.mrb[62].mxu0  ;;  %894 = vmatprep.mubr.bf16.mxu1 %v515_v32 }
 0x16a   :  { %v418_v38 = vadd.f32 %v417_v37, %v1435_v59  ;;  %v419_v39 = vpop.f32.mrb[63].mxu0  ;;  %895 = vmatmul.mubr.bf16.gmra.mrb[56].mxu1 %v514_v31  ;;  %v482_v41 = vmax.f32 %v414_v34, 0.0  ;;  %v1513_v59 = vrot.slane %v550_v47, %v84_v58 }
 0x16b   :  { %v420_v40 = vadd.f32 %v419_v39, %v1439_v60  ;;  %v483_v43 = vmax.f32 %v416_v36, 0.0 }
 0x16c   :  { %v484_v42 = vmax.f32 %v418_v38, 0.0 }
 0x16d   :  { %v485_v44 = vmax.f32 %v420_v40, 0.0 }
 0x16e   :  { %v516_v45 = vpack.c.bf16 %v484_v42, %v482_v41 }
 0x16f   :  { %v517_v46 = vpack.c.bf16 %v485_v44, %v483_v43 }
 0x171   :  { %904 = vmatprep.mubr.bf16.mxu1 %v517_v46 }
 0x172   :  { %905 = vmatmul.mubr.bf16.gmra.mrb[60].mxu1 %v516_v45 }
 0x1cd   :  { %v756_v60 = vpop.f32.mrb[0].mxu1 }
 0x1ce   :  { %v757_v49 = vadd.f32 %v756_v60, %v1509_v48  ;;  %v758_v50 = vpop.f32.mrb[1].mxu1 }
 0x1cf   :  { %v759_v53 = vadd.f32 %v758_v50, %v1513_v59  ;;  %v760_v57 = vpop.f32.mrb[2].mxu1 }
 0x1d0   :  { %v761_v61 = vadd.f32 %v760_v57, %v1509_v48  ;;  %v762_v62 = vpop.f32.mrb[3].mxu1  ;;  %v915_v2 = vmax.f32 %v757_v49, 0.0 }
 0x1d1   :  { %v763_v58 = vadd.f32 %v762_v62, %v1513_v59  ;;  %v916_v5 = vmax.f32 %v759_v53, 0.0 }
 0x1d2   :  { %v917_v3 = vmax.f32 %v761_v61, 0.0 }
 0x1d3   :  { %v918_v6 = vmax.f32 %v763_v58, 0.0 }
 0x1d4   :  { %v979_v7 = vpack.c.bf16 %v917_v3, %v915_v2 }
 0x1d5   :  { %v980_v9 = vpack.c.bf16 %v918_v6, %v916_v5  ;;  %v766_v10 = vpop.f32.mrb[4].mxu1 }
 0x1d6   :  { %v767_v11 = vadd.f32 %v766_v10, %v1509_v48  ;;  %v768_v12 = vpop.f32.mrb[5].mxu1 }
 0x1d7   :  { %v769_v13 = vadd.f32 %v768_v12, %v1513_v59  ;;  %v770_v14 = vpop.f32.mrb[6].mxu1  ;;  %1047 = vmatprep.subr.bf16.mxu0 %v980_v9 }
 0x1d8   :  { %v771_v16 = vadd.f32 %v770_v14, %v1509_v48  ;;  %v772_v55 = vpop.f32.mrb[7].mxu1  ;;  %1048 = vmatpush1.bf16.xpose.msra.mxu0 %v979_v7  ;;  %v919_v18 = vmax.f32 %v767_v11, 0.0 }
 0x1d9   :  { %v773_v17 = vadd.f32 %v772_v55, %v1513_v59  ;;  %v920_v20 = vmax.f32 %v769_v13, 0.0 }
 0x1da   :  { %v921_v19 = vmax.f32 %v771_v16, 0.0 }
 0x1db   :  { %v922_v21 = vmax.f32 %v773_v17, 0.0 }
 0x1dc   :  { %v981_v22 = vpack.c.bf16 %v921_v19, %v919_v18 }
 0x1dd   :  { %v982_v23 = vpack.c.bf16 %v922_v21, %v920_v20  ;;  %v776_v24 = vpop.f32.mrb[8].mxu1 }
 0x1de   :  { %v777_v25 = vadd.f32 %v776_v24, %v1509_v48  ;;  %v778_v26 = vpop.f32.mrb[9].mxu1 }
 0x1df   :  { %v779_v27 = vadd.f32 %v778_v26, %v1513_v59  ;;  %v780_v28 = vpop.f32.mrb[10].mxu1  ;;  %1049 = vmatprep.subr.bf16.mxu0 %v982_v23 }
 0x1e0   :  { %v781_v29 = vadd.f32 %v780_v28, %v1509_v48  ;;  %v782_v30 = vpop.f32.mrb[11].mxu1  ;;  %1050 = vmatpush1.bf16.xpose.msra.mxu0 %v981_v22  ;;  %v923_v32 = vmax.f32 %v777_v25, 0.0 }
 0x1e1   :  { %v783_v31 = vadd.f32 %v782_v30, %v1513_v59  ;;  %v924_v34 = vmax.f32 %v779_v27, 0.0 }
 0x1e2   :  { %v925_v33 = vmax.f32 %v781_v29, 0.0 }
 0x1e3   :  { %v926_v35 = vmax.f32 %v783_v31, 0.0 }
 0x1e4   :  { %v983_v36 = vpack.c.bf16 %v925_v33, %v923_v32 }
 0x1e5   :  { %v984_v37 = vpack.c.bf16 %v926_v35, %v924_v34  ;;  %v786_v38 = vpop.f32.mrb[12].mxu1 }
 0x1e6   :  { %v787_v39 = vadd.f32 %v786_v38, %v1509_v48  ;;  %v788_v40 = vpop.f32.mrb[13].mxu1 }
 0x1e7   :  { %v789_v41 = vadd.f32 %v788_v40, %v1513_v59  ;;  %v790_v42 = vpop.f32.mrb[14].mxu1  ;;  %1051 = vmatprep.subr.bf16.mxu0 %v984_v37 }
 0x1e8   :  { %v791_v43 = vadd.f32 %v790_v42, %v1509_v48  ;;  %v792_v44 = vpop.f32.mrb[15].mxu1  ;;  %1052 = vmatpush1.bf16.xpose.msra.mxu0 %v983_v36  ;;  %v927_v46 = vmax.f32 %v787_v39, 0.0 }
 0x1e9   :  { %v793_v45 = vadd.f32 %v792_v44, %v1513_v59  ;;  %v928_v60 = vmax.f32 %v789_v41, 0.0 }
 0x1ea   :  { %v929_v47 = vmax.f32 %v791_v43, 0.0 }
 0x1eb   :  { %v930_v49 = vmax.f32 %v793_v45, 0.0 }
 0x1ec   :  { %v985_v50 = vpack.c.bf16 %v929_v47, %v927_v46 }
 0x1ed   :  { %v986_v51 = vpack.c.bf16 %v930_v49, %v928_v60  ;;  %v796_v52 = vpop.f32.mrb[16].mxu1 }
 0x1ee   :  { %v797_v53 = vadd.f32 %v796_v52, %v1509_v48  ;;  %v798_v57 = vpop.f32.mrb[17].mxu1 }
 0x1ef   :  { %v799_v61 = vadd.f32 %v798_v57, %v1513_v59  ;;  %v800_v62 = vpop.f32.mrb[18].mxu1  ;;  %1053 = vmatprep.subr.bf16.mxu0 %v986_v51 }
 0x1f0   :  { %v801_v0 = vadd.f32 %v800_v62, %v1509_v48  ;;  %v802_v58 = vpop.f32.mrb[19].mxu1  ;;  %1054 = vmatpush1.bf16.xpose.msra.mxu0 %v985_v50  ;;  %v931_v2 = vmax.f32 %v797_v53, 0.0 }
 0x1f1   :  { %v803_v1 = vadd.f32 %v802_v58, %v1513_v59  ;;  %v932_v5 = vmax.f32 %v799_v61, 0.0 }
 0x1f2   :  { %v933_v3 = vmax.f32 %v801_v0, 0.0 }
 0x1f3   :  { %v934_v6 = vmax.f32 %v803_v1, 0.0 }
 0x1f4   :  { %v987_v7 = vpack.c.bf16 %v933_v3, %v931_v2 }
 0x1f5   :  { %v988_v8 = vpack.c.bf16 %v934_v6, %v932_v5  ;;  %v806_v9 = vpop.f32.mrb[20].mxu1 }
 0x1f6   :  { %v807_v10 = vadd.f32 %v806_v9, %v1509_v48  ;;  %v808_v11 = vpop.f32.mrb[21].mxu1 }
 0x1f7   :  { %v809_v12 = vadd.f32 %v808_v11, %v1513_v59  ;;  %v810_v13 = vpop.f32.mrb[22].mxu1  ;;  %1055 = vmatprep.subr.bf16.mxu0 %v988_v8 }
 0x1f8   :  { %v811_v14 = vadd.f32 %v810_v13, %v1509_v48  ;;  %v812_v15 = vpop.f32.mrb[23].mxu1  ;;  %1056 = vmatpush1.bf16.xpose.msra.mxu0 %v987_v7  ;;  %v935_v55 = vmax.f32 %v807_v10, 0.0 }
 0x1f9   :  { %v813_v16 = vadd.f32 %v812_v15, %v1513_v59  ;;  %v936_v18 = vmax.f32 %v809_v12, 0.0 }
 0x1fa   :  { %v937_v17 = vmax.f32 %v811_v14, 0.0 }
 0x1fb   :  { %v938_v19 = vmax.f32 %v813_v16, 0.0 }
 0x1fc   :  { %v989_v20 = vpack.c.bf16 %v937_v17, %v935_v55 }
 0x1fd   :  { %v990_v21 = vpack.c.bf16 %v938_v19, %v936_v18  ;;  %v816_v22 = vpop.f32.mrb[24].mxu1 }
 0x1fe   :  { %v817_v23 = vadd.f32 %v816_v22, %v1509_v48  ;;  %v818_v24 = vpop.f32.mrb[25].mxu1 }
 0x1ff   :  { %v819_v25 = vadd.f32 %v818_v24, %v1513_v59  ;;  %v820_v26 = vpop.f32.mrb[26].mxu1  ;;  %1057 = vmatprep.subr.bf16.mxu0 %v990_v21 }
 0x200   :  { %v821_v27 = vadd.f32 %v820_v26, %v1509_v48  ;;  %v822_v28 = vpop.f32.mrb[27].mxu1  ;;  %1058 = vmatpush1.bf16.xpose.msra.mxu0 %v989_v20  ;;  %v939_v30 = vmax.f32 %v817_v23, 0.0 }
 0x201   :  { %v823_v29 = vadd.f32 %v822_v28, %v1513_v59  ;;  %v940_v32 = vmax.f32 %v819_v25, 0.0 }
 0x202   :  { %v941_v31 = vmax.f32 %v821_v27, 0.0 }
 0x203   :  { %v942_v33 = vmax.f32 %v823_v29, 0.0 }
 0x204   :  { %v991_v34 = vpack.c.bf16 %v941_v31, %v939_v30 }
 0x205   :  { %v992_v35 = vpack.c.bf16 %v942_v33, %v940_v32  ;;  %v826_v36 = vpop.f32.mrb[28].mxu1 }
 0x206   :  { %v827_v37 = vadd.f32 %v826_v36, %v1509_v48  ;;  %v828_v38 = vpop.f32.mrb[29].mxu1 }
 0x207   :  { %v829_v39 = vadd.f32 %v828_v38, %v1513_v59  ;;  %v830_v40 = vpop.f32.mrb[30].mxu1  ;;  %1059 = vmatprep.subr.bf16.mxu0 %v992_v35 }
 0x208   :  { %v831_v41 = vadd.f32 %v830_v40, %v1509_v48  ;;  %v832_v42 = vpop.f32.mrb[31].mxu1  ;;  %1060 = vmatpush1.bf16.xpose.msra.mxu0 %v991_v34  ;;  %v943_v44 = vmax.f32 %v827_v37, 0.0 }
 0x209   :  { %v833_v43 = vadd.f32 %v832_v42, %v1513_v59  ;;  %v944_v46 = vmax.f32 %v829_v39, 0.0 }
 0x20a   :  { %v945_v45 = vmax.f32 %v831_v41, 0.0 }
 0x20b   :  { %v946_v47 = vmax.f32 %v833_v43, 0.0 }
 0x20c   :  { %v993_v60 = vpack.c.bf16 %v945_v45, %v943_v44 }
 0x20d   :  { %v994_v49 = vpack.c.bf16 %v946_v47, %v944_v46  ;;  %v836_v50 = vpop.f32.mrb[32].mxu1 }
 0x20e   :  { %v837_v51 = vadd.f32 %v836_v50, %v1509_v48  ;;  %v838_v52 = vpop.f32.mrb[33].mxu1 }
 0x20f   :  { %v839_v53 = vadd.f32 %v838_v52, %v1513_v59  ;;  %v840_v57 = vpop.f32.mrb[34].mxu1  ;;  %1061 = vmatprep.subr.bf16.mxu0 %v994_v49 }
 0x210   :  { %v841_v61 = vadd.f32 %v840_v57, %v1509_v48  ;;  %v842_v62 = vpop.f32.mrb[35].mxu1  ;;  %1062 = vmatpush1.bf16.xpose.msra.mxu0 %v993_v60  ;;  %v947_v58 = vmax.f32 %v837_v51, 0.0 }
 0x211   :  { %v843_v0 = vadd.f32 %v842_v62, %v1513_v59  ;;  %v948_v2 = vmax.f32 %v839_v53, 0.0 }
 0x212   :  { %v949_v1 = vmax.f32 %v841_v61, 0.0 }
 0x213   :  { %v950_v3 = vmax.f32 %v843_v0, 0.0 }
 0x214   :  { %v995_v5 = vpack.c.bf16 %v949_v1, %v947_v58 }
 0x215   :  { %v996_v6 = vpack.c.bf16 %v950_v3, %v948_v2  ;;  %v846_v7 = vpop.f32.mrb[36].mxu1 }
 0x216   :  { %v847_v8 = vadd.f32 %v846_v7, %v1509_v48  ;;  %v848_v9 = vpop.f32.mrb[37].mxu1 }
 0x217   :  { %v849_v10 = vadd.f32 %v848_v9, %v1513_v59  ;;  %v850_v11 = vpop.f32.mrb[38].mxu1  ;;  %1063 = vmatprep.subr.bf16.mxu0 %v996_v6 }
 0x218   :  { %v851_v12 = vadd.f32 %v850_v11, %v1509_v48  ;;  %v852_v13 = vpop.f32.mrb[39].mxu1  ;;  %1064 = vmatpush1.bf16.xpose.msra.mxu0 %v995_v5  ;;  %v951_v15 = vmax.f32 %v847_v8, 0.0 }
 0x219   :  { %v853_v14 = vadd.f32 %v852_v13, %v1513_v59  ;;  %v952_v55 = vmax.f32 %v849_v10, 0.0 }
 0x21a   :  { %v953_v16 = vmax.f32 %v851_v12, 0.0 }
 0x21b   :  { %v954_v17 = vmax.f32 %v853_v14, 0.0 }
 0x21c   :  { %v997_v18 = vpack.c.bf16 %v953_v16, %v951_v15 }
 0x21d   :  { %v998_v19 = vpack.c.bf16 %v954_v17, %v952_v55  ;;  %v856_v20 = vpop.f32.mrb[40].mxu1 }
 0x21e   :  { %v857_v21 = vadd.f32 %v856_v20, %v1509_v48  ;;  %v858_v22 = vpop.f32.mrb[41].mxu1 }
 0x21f   :  { %v859_v23 = vadd.f32 %v858_v22, %v1513_v59  ;;  %v860_v24 = vpop.f32.mrb[42].mxu1  ;;  %1065 = vmatprep.subr.bf16.mxu0 %v998_v19 }
 0x220   :  { %v861_v25 = vadd.f32 %v860_v24, %v1509_v48  ;;  %v862_v26 = vpop.f32.mrb[43].mxu1  ;;  %1066 = vmatpush1.bf16.xpose.msra.mxu0 %v997_v18  ;;  %v955_v28 = vmax.f32 %v857_v21, 0.0 }
 0x221   :  { %v863_v27 = vadd.f32 %v862_v26, %v1513_v59  ;;  %v956_v30 = vmax.f32 %v859_v23, 0.0 }
 0x222   :  { %v957_v29 = vmax.f32 %v861_v25, 0.0 }
 0x223   :  { %v958_v31 = vmax.f32 %v863_v27, 0.0 }
 0x224   :  { %v999_v32 = vpack.c.bf16 %v957_v29, %v955_v28 }
 0x225   :  { %v1000_v33 = vpack.c.bf16 %v958_v31, %v956_v30  ;;  %v866_v34 = vpop.f32.mrb[44].mxu1 }
 0x226   :  { %v867_v35 = vadd.f32 %v866_v34, %v1509_v48  ;;  %v868_v36 = vpop.f32.mrb[45].mxu1 }
 0x227   :  { %v869_v37 = vadd.f32 %v868_v36, %v1513_v59  ;;  %v870_v38 = vpop.f32.mrb[46].mxu1  ;;  %1067 = vmatprep.subr.bf16.mxu0 %v1000_v33 }
 0x228   :  { %v871_v39 = vadd.f32 %v870_v38, %v1509_v48  ;;  %v872_v40 = vpop.f32.mrb[47].mxu1  ;;  %1068 = vmatpush1.bf16.xpose.msra.mxu0 %v999_v32  ;;  %v959_v42 = vmax.f32 %v867_v35, 0.0 }
 0x229   :  { %v873_v41 = vadd.f32 %v872_v40, %v1513_v59  ;;  %v960_v44 = vmax.f32 %v869_v37, 0.0 }
 0x22a   :  { %v961_v43 = vmax.f32 %v871_v39, 0.0 }
 0x22b   :  { %v962_v45 = vmax.f32 %v873_v41, 0.0 }
 0x22c   :  { %v1001_v46 = vpack.c.bf16 %v961_v43, %v959_v42 }
 0x22d   :  { %v1002_v47 = vpack.c.bf16 %v962_v45, %v960_v44  ;;  %v876_v60 = vpop.f32.mrb[48].mxu1 }
 0x22e   :  { %v877_v49 = vadd.f32 %v876_v60, %v1509_v48  ;;  %v878_v50 = vpop.f32.mrb[49].mxu1 }
 0x22f   :  { %v879_v51 = vadd.f32 %v878_v50, %v1513_v59  ;;  %v880_v52 = vpop.f32.mrb[50].mxu1  ;;  %1069 = vmatprep.subr.bf16.mxu0 %v1002_v47  ;;  %v1016_v47 = vpop.permute.xlu0 %1015 }
 0x230   :  { %v881_v53 = vadd.f32 %v880_v52, %v1509_v48  ;;  %v882_v57 = vpop.f32.mrb[51].mxu1  ;;  %1070 = vmatpush1.bf16.xpose.msra.mxu0 %v1001_v46  ;;  %v963_v62 = vmax.f32 %v877_v49, 0.0  ;;  %v1037_v46 = vrot.slane %v1521_v63, %v1527_v4  ;;  %v1021_v60 = vrot.slane %v1016_v47, %v1428_v56 }
 0x231   :  { %v883_v61 = vadd.f32 %v882_v57, %v1513_v59  ;;  %v964_v58 = vmax.f32 %v879_v51, 0.0 }
 0x232   :  { %v965_v0 = vmax.f32 %v881_v53, 0.0 }
 0x233   :  { %v966_v1 = vmax.f32 %v883_v61, 0.0 }
 0x234   :  { %v1003_v2 = vpack.c.bf16 %v965_v0, %v963_v62 }
 0x235   :  { %v1004_v3 = vpack.c.bf16 %v966_v1, %v964_v58  ;;  %v886_v5 = vpop.f32.mrb[52].mxu1 }
 0x236   :  { %v887_v6 = vadd.f32 %v886_v5, %v1509_v48  ;;  %v888_v7 = vpop.f32.mrb[53].mxu1 }
 0x237   :  { %v889_v8 = vadd.f32 %v888_v7, %v1513_v59  ;;  %v890_v9 = vpop.f32.mrb[54].mxu1  ;;  %1071 = vmatprep.subr.bf16.mxu0 %v1004_v3 }
 0x238   :  { %v891_v10 = vadd.f32 %v890_v9, %v1509_v48  ;;  %v892_v11 = vpop.f32.mrb[55].mxu1  ;;  %1072 = vmatpush1.bf16.xpose.msra.mxu0 %v1003_v2  ;;  %v967_v13 = vmax.f32 %v887_v6, 0.0 }
 0x239   :  { %v893_v12 = vadd.f32 %v892_v11, %v1513_v59  ;;  %v968_v15 = vmax.f32 %v889_v8, 0.0 }
 0x23a   :  { %v969_v14 = vmax.f32 %v891_v10, 0.0 }
 0x23b   :  { %v970_v16 = vmax.f32 %v893_v12, 0.0 }
 0x23c   :  { %v1005_v55 = vpack.c.bf16 %v969_v14, %v967_v13 }
 0x23d   :  { %v1006_v17 = vpack.c.bf16 %v970_v16, %v968_v15  ;;  %v896_v18 = vpop.f32.mrb[56].mxu1 }
 0x23e   :  { %v897_v19 = vadd.f32 %v896_v18, %v1509_v48  ;;  %v898_v20 = vpop.f32.mrb[57].mxu1 }
 0x23f   :  { %v899_v21 = vadd.f32 %v898_v20, %v1513_v59  ;;  %v900_v22 = vpop.f32.mrb[58].mxu1  ;;  %1073 = vmatprep.subr.bf16.mxu0 %v1006_v17 }
 0x240   :  { %v901_v23 = vadd.f32 %v900_v22, %v1509_v48  ;;  %v902_v24 = vpop.f32.mrb[59].mxu1  ;;  %1074 = vmatpush1.bf16.xpose.msra.mxu0 %v1005_v55  ;;  %v971_v26 = vmax.f32 %v897_v19, 0.0 }
 0x241   :  { %v903_v25 = vadd.f32 %v902_v24, %v1513_v59  ;;  %v972_v28 = vmax.f32 %v899_v21, 0.0 }
 0x242   :  { %v973_v27 = vmax.f32 %v901_v23, 0.0 }
 0x243   :  { %v974_v29 = vmax.f32 %v903_v25, 0.0 }
 0x244   :  { %v1007_v30 = vpack.c.bf16 %v973_v27, %v971_v26 }
 0x245   :  { %v1008_v31 = vpack.c.bf16 %v974_v29, %v972_v28  ;;  %v906_v32 = vpop.f32.mrb[60].mxu1 }
 0x246   :  { %v907_v33 = vadd.f32 %v906_v32, %v1509_v48  ;;  %v908_v34 = vpop.f32.mrb[61].mxu1 }
 0x247   :  { %v909_v35 = vadd.f32 %v908_v34, %v1513_v59  ;;  %v910_v36 = vpop.f32.mrb[62].mxu1  ;;  %1075 = vmatprep.subr.bf16.mxu0 %v1008_v31 }
 0x248   :  { %v911_v37 = vadd.f32 %v910_v36, %v1509_v48  ;;  %v912_v38 = vpop.f32.mrb[63].mxu1  ;;  %1076 = vmatpush1.bf16.xpose.msra.mxu0 %v1007_v30  ;;  %v975_v40 = vmax.f32 %v907_v33, 0.0 }
 0x249   :  { %v913_v39 = vadd.f32 %v912_v38, %v1513_v59  ;;  %v976_v42 = vmax.f32 %v909_v35, 0.0 }
 0x24a   :  { %v977_v41 = vmax.f32 %v911_v37, 0.0 }
 0x24b   :  { %v978_v43 = vmax.f32 %v913_v39, 0.0 }
 0x24c   :  { %v1009_v44 = vpack.c.bf16 %v977_v41, %v975_v40 }
 0x24d   :  { %v1010_v45 = vpack.c.bf16 %v978_v43, %v976_v42 }
 0x24f   :  { %1077 = vmatprep.subr.bf16.mxu0 %v1010_v45 }
 0x250   :  { %1078 = vmatpush1.bf16.xpose.msra.mxu0 %v1009_v44 }
 0x257   :  { %1080 = vmatmul.mubr.bf16.vlgmr.msra.gmra.mrb[64].mxu0 %v1037_v46 }
 0x32a   :  { %v1081_v48 = vpop.f32.mrb[64].mxu0 }
 0x32b   :  { %v1082_v49 = vadd.f32 %v1081_v48, %v1021_v60  ;;  %v1083_v50 = vpop.f32.mrb[65].mxu0 }
 0x32c   :  { %v1084_v51 = vadd.f32 %v1083_v50, %v1021_v60  ;;  %v1085_v59 = vpop.f32.mrb[66].mxu0 }
 0x32d   :  { %v1086_v52 = vpop.f32.mrb[67].mxu0 }
 0x32e   :  { %v1090_v53 = vcombine.low %v1082_v49, %v1084_v51 }
 0x330   :  { %v1097_v57 = vrot.slane %v1090_v53, %v1527_v4 }
 0x332   :  { %v1104_v61 = vrot.slane %v1097_v57, %v1527_v4 }
 0x334   :  { %1110 = vst.msk [vmem:[%s1606_s7] sm:$0x3] %vm1108_vm2, %v1104_v61 }
 0x335   :  { %1115 = vsyncpa [#allocation4], 1 }

</bundles_post_ra>
